<compile_context>
chip_gen: v7x
topology: tpu7x:2x2x1
jax: 0.10.0
libtpu: 0.0.40
codegen_flags: <defaults>
</compile_context>

<pallas_src>
import functools

import jax
import jax.numpy as jnp
from jax.experimental import pallas as pl
from jax.experimental.pallas import tpu as pltpu


# ----------------------------- Pallas kernel -------------------------------


def _conv_bn_act_kernel(x_ref, w_ref, s_ref, b_ref, o_ref, *scratch,
                        K, Wp, L, cin, fold, act):
    """One (row-tile, cout-tile) block of fused conv + affine + activation.

    x_ref : (cin, Ltile) bf16   padded rows of this tile, flattened over
                                (R+K, Wp) row-major (extra row = lane tail).
    w_ref : fold=True : (cout_tile, K*K*cin) bf16
            fold=False: (K*K, cout_tile, cin) bf16 per-tap matrices.
    s_ref : (cout_tile, 1) f32  per-channel scale (BN folded).
    b_ref : (cout_tile, 1) f32  per-channel shift (conv bias + BN folded).
    o_ref : (cout_tile, L) with L = R*Wp; columns >= W of each row are junk
            (cropped by the wrapper) so stores stay lane-dense.
    scratch: fold path only -> (K*K*cin, L) bf16 staging buffer in VMEM.
    """
    if fold:
        # Small Cin: fold the K*K taps into the contraction dimension so the
        # MXU sees one deep matmul instead of K*K shallow ones.
        rhs_ref, = scratch
        for tap in range(K * K):
            ky, kx = divmod(tap, K)
            start = ky * Wp + kx                       # static offsets
            rhs_ref[tap * cin:(tap + 1) * cin, :] = x_ref[:, start:start + L]
        acc = jnp.dot(w_ref[...], rhs_ref[...],
                      preferred_element_type=jnp.float32)
    else:
        # Large Cin: K*K shifted matmuls, accumulator seeded by the first dot.
        acc = jnp.dot(w_ref[0], x_ref[:, 0:L],
                      preferred_element_type=jnp.float32)
        for tap in range(1, K * K):
            ky, kx = divmod(tap, K)
            start = ky * Wp + kx
            acc = acc + jnp.dot(w_ref[tap], x_ref[:, start:start + L],
                                preferred_element_type=jnp.float32)

    y = acc * s_ref[...] + b_ref[...]                  # folded bias + BN (f32)
    if act == "relu":
        y = jnp.maximum(y, 0.0)
    elif act == "leaky_relu":
        y = jnp.where(y >= 0.0, y, 0.01 * y)
    elif act != "identity":
        raise ValueError(f"unsupported activation: {act}")
    o_ref[...] = y.astype(o_ref.dtype)


# ------------------------------ Forward pass -------------------------------


def conv_block_forward(x, weight, bias=None, *, bn_params=None, act="relu",
                       stride=1, dilation=1, row_tile=None, cout_tile=None):
    """Pallas forward of Conv_Block.

    x:       (N, Cin, H, W) float32, NCHW (PyTorch layout).
    weight:  (Cout, Cin, K, K) OIHW.
    bias:    (Cout,) or None.
    bn_params: None (bn=False) or dict(gamma, beta, mean, var, eps) for
               eval-mode BatchNorm2d folded into scale/shift.
    returns: (N, Cout, H, W) float32.
    """
    if stride != 1 or dilation != 1:
        raise NotImplementedError("only stride=1, dilation=1 are implemented")

    N, Cin, H, W = x.shape
    Cout, Cin_w, K, K2 = weight.shape
    if K != K2 or Cin_w != Cin:
        raise ValueError("weight shape mismatch")
    if K % 2 != 1:
        raise NotImplementedError(
            "shifted-slice conv formulation requires an odd kernel size")

    p = K // 2
    Wp = W + 2 * p                                     # padded row width

    # Pad Cin to a sublane multiple so folded-RHS staging stores stay aligned.
    Cp = -(-Cin // 8) * 8
    fold = Cp <= 64                                    # fold taps for small Cin
    KKC = K * K * Cp

    # ---- fold conv bias + eval-mode BN into per-channel scale/shift (f32) ----
    if bn_params is not None:
        scale = bn_params["gamma"] * jax.lax.rsqrt(
            bn_params["var"] + bn_params["eps"])
        shift = bn_params["beta"] - bn_params["mean"] * scale
    else:
        scale = jnp.ones((Cout,), jnp.float32)
        shift = jnp.zeros((Cout,), jnp.float32)
    if bias is not None:
        shift = shift + scale * bias
    scale2d = scale.reshape(Cout, 1).astype(jnp.float32)
    shift2d = shift.reshape(Cout, 1).astype(jnp.float32)

    # ---- Cout tiling (v5e may prefer 128-wide tiles; 256 feeds v6e/v7x MXU) ----
    if cout_tile is None:
        if Cout > 256 and Cout % 256 == 0:
            cout_tile = 256
        elif Cout > 256 and Cout % 128 == 0:
            cout_tile = 128
        else:
            cout_tile = Cout
    if Cout % cout_tile != 0:
        cout_tile = Cout
    CT = Cout // cout_tile

    # ---- per-generation VMEM budget and row-tile choice ----
    try:
        vmem_cap = pltpu.get_tpu_info().vmem_capacity_bytes
    except Exception:
        vmem_cap = 64 * 1024 * 1024                    # conservative fallback
    vmem_limit = max(32 * 1024 * 1024,
                     min((vmem_cap * 3) // 4, 100 * 1024 * 1024))

    if row_tile is None:
        row_tile = max(1, 4096 // Wp)                  # target ~4k output lanes
    R = max(1, min(int(row_tile), H))

    def _block_bytes(r):
        ltile = (r + K) * Wp
        l = r * Wp
        b = 2 * Cp * ltile * 2                         # bf16 x tile, dbl-buf
        b += 2 * cout_tile * KKC * 2                   # bf16 weights, dbl-buf
        b += 3 * cout_tile * l * 4                     # f32 out (dbl-buf) + acc
        if fold:
            b += KKC * l * 2                           # bf16 rhs scratch
        return b

    while R > 1 and _block_bytes(R) > (vmem_limit * 3) // 5:
        R = (R + 1) // 2
    T = -(-H // R)                                     # number of row tiles

    Rh1 = R + K                  # R rows need R+K-1 padded rows; +1 = lane tail
    Ltile = Rh1 * Wp
    L = R * Wp                                         # lane-dense output width
    HpT = T * R + K - 1                                # padded rows needed

    # ---- input glue: single pad (channels+rows+cols) + halo'd row-tile gather ----
    xpad = jnp.pad(x, ((0, 0), (0, Cp - Cin), (p, HpT - H - p), (p, p)))
    row_idx = jnp.minimum(
        jnp.arange(T)[:, None] * R + jnp.arange(Rh1)[None, :], HpT - 1)
    xt = xpad[:, :, row_idx, :]                        # (N, Cp, T, Rh1, Wp)
    xt = xt.transpose(0, 2, 1, 3, 4).reshape(N, T, Cp, Ltile)
    xt = xt.astype(jnp.bfloat16)                       # MXU-native operands

    # ---- weights (bf16), layout per kernel path ----
    wpad = jnp.pad(weight, ((0, 0), (0, Cp - Cin), (0, 0), (0, 0)))
    if fold:
        w_arr = jnp.transpose(wpad, (0, 2, 3, 1)).reshape(Cout, KKC)
        w_spec = pl.BlockSpec((cout_tile, KKC), lambda n, t, ct: (ct, 0))
        scratch_shapes = [pltpu.VMEM((KKC, L), jnp.bfloat16)]
    else:
        w_arr = jnp.transpose(wpad, (2, 3, 0, 1)).reshape(K * K, Cout, Cp)
        w_spec = pl.BlockSpec((K * K, cout_tile, Cp), lambda n, t, ct: (0, ct, 0))
        scratch_shapes = []
    w_arr = w_arr.astype(jnp.bfloat16)

    kernel = functools.partial(_conv_bn_act_kernel, K=K, Wp=Wp, L=L, cin=Cp,
                               fold=fold, act=act)

    flops = 2 * N * T * L * KKC * Cout
    bytes_accessed = (2 * N * T * Cp * Ltile + 2 * Cout * KKC + 8 * Cout
                      + 4 * N * T * Cout * L)

    out = pl.pallas_call(
        kernel,
        out_shape=jax.ShapeDtypeStruct((N, T, Cout, L), x.dtype),
        grid=(N, T, CT),
        in_specs=[
            pl.BlockSpec((None, None, Cp, Ltile), lambda n, t, ct: (n, t, 0, 0)),
            w_spec,
            pl.BlockSpec((cout_tile, 1), lambda n, t, ct: (ct, 0)),
            pl.BlockSpec((cout_tile, 1), lambda n, t, ct: (ct, 0)),
        ],
        out_specs=pl.BlockSpec((None, None, cout_tile, L),
                               lambda n, t, ct: (n, t, ct, 0)),
        scratch_shapes=scratch_shapes,
        compiler_params=pltpu.CompilerParams(
            dimension_semantics=("parallel", "parallel", "parallel"),
            vmem_limit_bytes=int(vmem_limit),
        ),
        cost_estimate=pl.CostEstimate(flops=flops, transcendentals=0,
                                      bytes_accessed=bytes_accessed),
    )(xt, w_arr, scale2d, shift2d)

    # NCHW result; drop the row/col junk produced by the lane-dense layout.
    out = out.reshape(N, T, Cout, R, Wp).transpose(0, 2, 1, 3, 4)
    out = out.reshape(N, Cout, T * R, Wp)
    return out[:, :, :H, :W]


# --------------------------- Pure-JAX reference ----------------------------


def conv_block_reference(x, weight, bias, bn_params, act):
    out = jax.lax.conv_general_dilated(
        x, weight, window_strides=(1, 1), padding="SAME",
        dimension_numbers=("NCHW", "OIHW", "NCHW"),
        precision=jax.lax.Precision.HIGHEST)
    if bias is not None:
        out = out + bias[None, :, None, None]
    if bn_params is not None:
        scale = bn_params["gamma"] * jax.lax.rsqrt(
            bn_params["var"] + bn_params["eps"])
        shift = bn_params["beta"] - bn_params["mean"] * scale
        out = out * scale[None, :, None, None] + shift[None, :, None, None]
    if act == "relu":
        out = jnp.maximum(out, 0.0)
    elif act == "leaky_relu":
        out = jnp.where(out >= 0.0, out, 0.01 * out)
    return out


# ---------------------------------- main -----------------------------------


if __name__ == "__main__":
    N, Cin, H, W = 2, 4, 16, 16
    Cout, K = 8, 3

    key = jax.random.PRNGKey(0)
    k = jax.random.split(key, 7)
    fan_in = Cin * K * K
    bound = 1.0 / (fan_in ** 0.5)

    x = jax.random.normal(k[0], (N, Cin, H, W), jnp.float32)
    weight = jax.random.uniform(k[1], (Cout, Cin, K, K), jnp.float32, -bound, bound)
    bias = jax.random.uniform(k[2], (Cout,), jnp.float32, -bound, bound)
    # Round conv operands to bf16-representable values so the bf16-MXU kernel
    # can be checked tightly against the f32 reference.
    x = x.astype(jnp.bfloat16).astype(jnp.float32)
    weight = weight.astype(jnp.bfloat16).astype(jnp.float32)
    bn_params = dict(
        gamma=jax.random.uniform(k[3], (Cout,), jnp.float32, 0.5, 1.5),
        beta=jax.random.uniform(k[4], (Cout,), jnp.float32, -0.5, 0.5),
        mean=0.1 * jax.random.normal(k[5], (Cout,), jnp.float32),
        var=jax.random.uniform(k[6], (Cout,), jnp.float32, 0.5, 1.5),
        eps=1e-5,
    )

    out = conv_block_forward(x, weight, bias, bn_params=bn_params, act="relu",
                             row_tile=8)     # 2 row tiles -> exercises tiling
    out = jax.block_until_ready(out)

    ref = conv_block_reference(x, weight, bias, bn_params, "relu")
    ref = jax.block_until_ready(ref)

    assert out.shape == (N, Cout, H, W)
    assert jnp.allclose(out, ref, rtol=1e-2, atol=1e-2), (
        float(jnp.max(jnp.abs(out - ref))))

    print("KERNEL_OK")
</pallas_src>

<mosaic_0001>
module attributes {stable_mosaic.version = 11 : i64} {
  func.func @_conv_bn_act_kernel(%arg0: i32, %arg1: i32, %arg2: i32, %arg3: memref<1x1x8x198xbf16, #tpu.memory_space<vmem>>, %arg4: memref<8x72xbf16, #tpu.memory_space<vmem>>, %arg5: memref<8x1xf32, #tpu.memory_space<vmem>>, %arg6: memref<8x1xf32, #tpu.memory_space<vmem>>, %arg7: memref<1x1x8x144xf32, #tpu.memory_space<vmem>>, %arg8: memref<72x144xbf16, #tpu.memory_space<vmem>>) attributes {dimension_semantics = [#tpu.dimension_semantics<parallel>, #tpu.dimension_semantics<parallel>, #tpu.dimension_semantics<parallel>], iteration_bounds = array<i64: 2, 2, 1>, scalar_prefetch = 0 : i64, scratch_operands = 1 : i64, tpu.core_type = #tpu.core_type<tc>, window_params = [{transform_indices = @transform_0, window_bounds = array<i64: 1, 1, 8, 198>}, {transform_indices = @transform_1, window_bounds = array<i64: 8, 72>}, {transform_indices = @transform_2, window_bounds = array<i64: 8, 1>}, {transform_indices = @transform_3, window_bounds = array<i64: 8, 1>}, {transform_indices = @transform_4, window_bounds = array<i64: 1, 1, 8, 144>}]} {
    %c0 = arith.constant 0 : index
    %c0_0 = arith.constant 0 : index
    %c0_1 = arith.constant 0 : index
    %c0_2 = arith.constant 0 : index
    %0 = vector.load %arg3[%c0, %c0_0, %c0_1, %c0_2] : memref<1x1x8x198xbf16, #tpu.memory_space<vmem>>, vector<1x1x8x144xbf16>
    %1 = vector.shape_cast %0 : vector<1x1x8x144xbf16> to vector<8x144xbf16>
    %c0_3 = arith.constant 0 : index
    %c0_4 = arith.constant 0 : index
    %2 = vector.load %arg8[%c0_3, %c0_4] : memref<72x144xbf16, #tpu.memory_space<vmem>>, vector<8x144xbf16>
    tpu.vector_store %arg8[%c0_3, %c0_4], %1 {strides = array<i32>} : memref<72x144xbf16, #tpu.memory_space<vmem>>, vector<8x144xbf16>,
    %c0_5 = arith.constant 0 : index
    %c0_6 = arith.constant 0 : index
    %c0_7 = arith.constant 0 : index
    %c1 = arith.constant 1 : index
    %3 = vector.load %arg3[%c0_5, %c0_6, %c0_7, %c1] : memref<1x1x8x198xbf16, #tpu.memory_space<vmem>>, vector<1x1x8x144xbf16>
    %4 = vector.shape_cast %3 : vector<1x1x8x144xbf16> to vector<8x144xbf16>
    %c8 = arith.constant 8 : index
    %c0_8 = arith.constant 0 : index
    %5 = vector.load %arg8[%c8, %c0_8] : memref<72x144xbf16, #tpu.memory_space<vmem>>, vector<8x144xbf16>
    tpu.vector_store %arg8[%c8, %c0_8], %4 {strides = array<i32>} : memref<72x144xbf16, #tpu.memory_space<vmem>>, vector<8x144xbf16>,
    %c0_9 = arith.constant 0 : index
    %c0_10 = arith.constant 0 : index
    %c0_11 = arith.constant 0 : index
    %c2 = arith.constant 2 : index
    %6 = vector.load %arg3[%c0_9, %c0_10, %c0_11, %c2] : memref<1x1x8x198xbf16, #tpu.memory_space<vmem>>, vector<1x1x8x144xbf16>
    %7 = vector.shape_cast %6 : vector<1x1x8x144xbf16> to vector<8x144xbf16>
    %c16 = arith.constant 16 : index
    %c0_12 = arith.constant 0 : index
    %8 = vector.load %arg8[%c16, %c0_12] : memref<72x144xbf16, #tpu.memory_space<vmem>>, vector<8x144xbf16>
    tpu.vector_store %arg8[%c16, %c0_12], %7 {strides = array<i32>} : memref<72x144xbf16, #tpu.memory_space<vmem>>, vector<8x144xbf16>,
    %c0_13 = arith.constant 0 : index
    %c0_14 = arith.constant 0 : index
    %c0_15 = arith.constant 0 : index
    %c18 = arith.constant 18 : index
    %9 = vector.load %arg3[%c0_13, %c0_14, %c0_15, %c18] : memref<1x1x8x198xbf16, #tpu.memory_space<vmem>>, vector<1x1x8x144xbf16>
    %10 = vector.shape_cast %9 : vector<1x1x8x144xbf16> to vector<8x144xbf16>
    %c24 = arith.constant 24 : index
    %c0_16 = arith.constant 0 : index
    %11 = vector.load %arg8[%c24, %c0_16] : memref<72x144xbf16, #tpu.memory_space<vmem>>, vector<8x144xbf16>
    tpu.vector_store %arg8[%c24, %c0_16], %10 {strides = array<i32>} : memref<72x144xbf16, #tpu.memory_space<vmem>>, vector<8x144xbf16>,
    %c0_17 = arith.constant 0 : index
    %c0_18 = arith.constant 0 : index
    %c0_19 = arith.constant 0 : index
    %c19 = arith.constant 19 : index
    %12 = vector.load %arg3[%c0_17, %c0_18, %c0_19, %c19] : memref<1x1x8x198xbf16, #tpu.memory_space<vmem>>, vector<1x1x8x144xbf16>
    %13 = vector.shape_cast %12 : vector<1x1x8x144xbf16> to vector<8x144xbf16>
    %c32 = arith.constant 32 : index
    %c0_20 = arith.constant 0 : index
    %14 = vector.load %arg8[%c32, %c0_20] : memref<72x144xbf16, #tpu.memory_space<vmem>>, vector<8x144xbf16>
    tpu.vector_store %arg8[%c32, %c0_20], %13 {strides = array<i32>} : memref<72x144xbf16, #tpu.memory_space<vmem>>, vector<8x144xbf16>,
    %c0_21 = arith.constant 0 : index
    %c0_22 = arith.constant 0 : index
    %c0_23 = arith.constant 0 : index
    %c20 = arith.constant 20 : index
    %15 = vector.load %arg3[%c0_21, %c0_22, %c0_23, %c20] : memref<1x1x8x198xbf16, #tpu.memory_space<vmem>>, vector<1x1x8x144xbf16>
    %16 = vector.shape_cast %15 : vector<1x1x8x144xbf16> to vector<8x144xbf16>
    %c40 = arith.constant 40 : index
    %c0_24 = arith.constant 0 : index
    %17 = vector.load %arg8[%c40, %c0_24] : memref<72x144xbf16, #tpu.memory_space<vmem>>, vector<8x144xbf16>
    tpu.vector_store %arg8[%c40, %c0_24], %16 {strides = array<i32>} : memref<72x144xbf16, #tpu.memory_space<vmem>>, vector<8x144xbf16>,
    %c0_25 = arith.constant 0 : index
    %c0_26 = arith.constant 0 : index
    %c0_27 = arith.constant 0 : index
    %c36 = arith.constant 36 : index
    %18 = vector.load %arg3[%c0_25, %c0_26, %c0_27, %c36] : memref<1x1x8x198xbf16, #tpu.memory_space<vmem>>, vector<1x1x8x144xbf16>
    %19 = vector.shape_cast %18 : vector<1x1x8x144xbf16> to vector<8x144xbf16>
    %c48 = arith.constant 48 : index
    %c0_28 = arith.constant 0 : index
    %20 = vector.load %arg8[%c48, %c0_28] : memref<72x144xbf16, #tpu.memory_space<vmem>>, vector<8x144xbf16>
    tpu.vector_store %arg8[%c48, %c0_28], %19 {strides = array<i32>} : memref<72x144xbf16, #tpu.memory_space<vmem>>, vector<8x144xbf16>,
    %c0_29 = arith.constant 0 : index
    %c0_30 = arith.constant 0 : index
    %c0_31 = arith.constant 0 : index
    %c37 = arith.constant 37 : index
    %21 = vector.load %arg3[%c0_29, %c0_30, %c0_31, %c37] : memref<1x1x8x198xbf16, #tpu.memory_space<vmem>>, vector<1x1x8x144xbf16>
    %22 = vector.shape_cast %21 : vector<1x1x8x144xbf16> to vector<8x144xbf16>
    %c56 = arith.constant 56 : index
    %c0_32 = arith.constant 0 : index
    %23 = vector.load %arg8[%c56, %c0_32] : memref<72x144xbf16, #tpu.memory_space<vmem>>, vector<8x144xbf16>
    tpu.vector_store %arg8[%c56, %c0_32], %22 {strides = array<i32>} : memref<72x144xbf16, #tpu.memory_space<vmem>>, vector<8x144xbf16>,
    %c0_33 = arith.constant 0 : index
    %c0_34 = arith.constant 0 : index
    %c0_35 = arith.constant 0 : index
    %c38 = arith.constant 38 : index
    %24 = vector.load %arg3[%c0_33, %c0_34, %c0_35, %c38] : memref<1x1x8x198xbf16, #tpu.memory_space<vmem>>, vector<1x1x8x144xbf16>
    %25 = vector.shape_cast %24 : vector<1x1x8x144xbf16> to vector<8x144xbf16>
    %c64 = arith.constant 64 : index
    %c0_36 = arith.constant 0 : index
    %26 = vector.load %arg8[%c64, %c0_36] : memref<72x144xbf16, #tpu.memory_space<vmem>>, vector<8x144xbf16>
    tpu.vector_store %arg8[%c64, %c0_36], %25 {strides = array<i32>} : memref<72x144xbf16, #tpu.memory_space<vmem>>, vector<8x144xbf16>,
    %c0_37 = arith.constant 0 : index
    %c0_38 = arith.constant 0 : index
    %27 = vector.load %arg4[%c0_37, %c0_38] : memref<8x72xbf16, #tpu.memory_space<vmem>>, vector<8x72xbf16>
    %c0_39 = arith.constant 0 : index
    %c0_40 = arith.constant 0 : index
    %28 = vector.load %arg8[%c0_39, %c0_40] : memref<72x144xbf16, #tpu.memory_space<vmem>>, vector<72x144xbf16>
    %cst = arith.constant dense<0.000000e+00> : vector<8x144xf32>
    %29 = tpu.matmul %27, %28, %cst {dimension_numbers = #tpu.dot_dimension_numbers<[1], [0], [0], [1], [0, 0, 1, 1], [], []>} : vector<8x72xbf16>, vector<72x144xbf16>, vector<8x144xf32> -> vector<8x144xf32>
    %c0_41 = arith.constant 0 : index
    %c0_42 = arith.constant 0 : index
    %30 = vector.load %arg5[%c0_41, %c0_42] : memref<8x1xf32, #tpu.memory_space<vmem>>, vector<8x1xf32>
    %31 = vector.broadcast %30 : vector<8x1xf32> to vector<8x144xf32>
    %32 = arith.mulf %29, %31 : vector<8x144xf32>
    %c0_43 = arith.constant 0 : index
    %c0_44 = arith.constant 0 : index
    %33 = vector.load %arg6[%c0_43, %c0_44] : memref<8x1xf32, #tpu.memory_space<vmem>>, vector<8x1xf32>
    %34 = vector.broadcast %33 : vector<8x1xf32> to vector<8x144xf32>
    %35 = arith.addf %32, %34 : vector<8x144xf32>
    %cst_45 = arith.constant 0.000000e+00 : f32
    %36 = vector.broadcast %cst_45 : f32 to vector<8x144xf32>
    %37 = arith.maximumf %35, %36 : vector<8x144xf32>
    %c0_46 = arith.constant 0 : index
    %c0_47 = arith.constant 0 : index
    %c0_48 = arith.constant 0 : index
    %c0_49 = arith.constant 0 : index
    %38 = vector.load %arg7[%c0_46, %c0_47, %c0_48, %c0_49] : memref<1x1x8x144xf32, #tpu.memory_space<vmem>>, vector<1x1x8x144xf32>
    %39 = vector.shape_cast %38 : vector<1x1x8x144xf32> to vector<8x144xf32>
    %40 = vector.shape_cast %37 : vector<8x144xf32> to vector<1x1x8x144xf32>
    tpu.vector_store %arg7[%c0_46, %c0_47, %c0_48, %c0_49], %40 {strides = array<i32>} : memref<1x1x8x144xf32, #tpu.memory_space<vmem>>, vector<1x1x8x144xf32>,
    return
  }
  func.func @transform_0(%arg0: i32, %arg1: i32, %arg2: i32) -> (i32, i32, i32, i32) {
    %c0_i32 = arith.constant 0 : i32
    %c0_i32_0 = arith.constant 0 : i32
    %c0_i32_1 = arith.constant 0 : i32
    return %arg0, %arg1, %c0_i32, %c0_i32_0 : i32, i32, i32, i32
  }
  func.func @transform_1(%arg0: i32, %arg1: i32, %arg2: i32) -> (i32, i32) {
    %c0_i32 = arith.constant 0 : i32
    %c0_i32_0 = arith.constant 0 : i32
    return %arg2, %c0_i32 : i32, i32
  }
  func.func @transform_2(%arg0: i32, %arg1: i32, %arg2: i32) -> (i32, i32) {
    %c0_i32 = arith.constant 0 : i32
    %c0_i32_0 = arith.constant 0 : i32
    return %arg2, %c0_i32 : i32, i32
  }
  func.func @transform_3(%arg0: i32, %arg1: i32, %arg2: i32) -> (i32, i32) {
    %c0_i32 = arith.constant 0 : i32
    %c0_i32_0 = arith.constant 0 : i32
    return %arg2, %c0_i32 : i32, i32
  }
  func.func @transform_4(%arg0: i32, %arg1: i32, %arg2: i32) -> (i32, i32, i32, i32) {
    %c0_i32 = arith.constant 0 : i32
    %c0_i32_0 = arith.constant 0 : i32
    return %arg0, %arg1, %arg2, %c0_i32 : i32, i32, i32, i32
  }
}

</mosaic_0001>

<bundles_post_ra>
// kernel: tpu_custom_call.1
= control target key start
LH: loop header
LB: loop body
LE: loop exit
PB: predicated region body
PF: predicated region fallthrough
CT: control target
= control target key end

     0   :  { %9 = vsyncpa [#allocation4], 0  ;;  %s1183_s0 = inlined_call_operand.hbm [shape: bf16[2,2,8,198], index: 0, kind: input, shape index: {}]   ;;  %s1184_s1 = inlined_call_operand.vmem [shape: bf16[8,72], index: 1, kind: input, shape index: {}]   ;;  %s1185_s2 = inlined_call_operand.vmem [shape: f32[8,1], index: 2, kind: input, shape index: {}]   ;;  %s1186_s3 = inlined_call_operand.vmem [shape: f32[8,1], index: 3, kind: input, shape index: {}]   ;;  %s1187_s4 = inlined_call_operand.hbm [shape: f32[2,2,8,144], index: 4, kind: output, shape index: {}]  }
   0x1   :  { %11 = vsyncpa [#allocation4 + $0x1], 0 }
   0x2   :  { %12 = vsyncpa [#allocation5], 0 }
   0x3   :  { %14 = vsyncpa [#allocation5 + $0x1], 0  ;;  %s954_s15 = smov 0   ;;  %s956_s16 = smov 0  }
   0x4   :  { %s958_s17 = smov 0   ;;  %s960_s18 = smov 0  }
   0x5   :  { %s962_s19 = smov 0   ;;  %s964_s20 = smov 0  }
   0x6   :  { %s966_s21 = smov 0   ;;  %s968_s22 = smov 0  }
   0x7 LB: > { %s653_s23 = sadd.s32 4294967295, %s916_s22   ;;  %s654_s24 = sadd.s32 4294967294, %s916_s22   ;;  %s916_s22 = sphi %s968_s22, %s20_s22   ;;  %s912_s21 = sphi %s966_s21, %s1209_s21   ;;  %s908_s20 = sphi %s964_s20, %s1208_s20   ;;  %s904_s19 = sphi %s962_s19, %s1207_s19   ;;  %s900_s18 = sphi %s960_s18, %s1206_s18   ;;  %s896_s17 = sphi %s958_s17, %s1205_s17   ;;  %s892_s16 = sphi %s956_s16, %s1204_s16   ;;  %s888_s15 = sphi %s954_s15, %s1203_s15  }
   0x8   : > { %s35_s25 = sadd.s32 1, %s908_s20  ;;  %s39_s26 = sadd.s32 1, %s912_s21 }
   0x9   : > { %p37_p0 = scmp.ge.s32.totalorder %s35_s25, 2  ;;  %s48_s27 = sadd.s32 1, %s896_s17 }
   0xa   : > { %p55_p1 = scmp.ne.s32.totalorder %s896_s17, %s892_s16  ;;  %p56_p2 = scmp.eq.s32.totalorder %s916_s22, 0 }
   0xb   : > { %s1211_s25 = smov (%p37_p0, %s35_s25), 0  ;;  %s1213_s26 = smov (!%p37_p0, %s39_s26), %s912_s21 }
   0xc   : > { %s44_s28 = ssub.s32 %s908_s20, %s1211_s25  ;;  %p1007_p3 = por %p56_p2, %p55_p1 }
   0xd   : > { %p41_p4 = scmp.ge.s32.totalorder %s1213_s26, 2  ;;  %p61_p5 = scmp.ne.s32.totalorder %s892_s16, %s888_s15 }
   0xe   : > { %p62_p6 = scmp.eq.s32.totalorder %s653_s23, 0  ;;  %p167_p7 = scmp.eq.s32.totalorder %s653_s23, 3 }
   0xf   : > { %s1215_s26 = smov (%p41_p4, %s1213_s26), 0  ;;  %p173_p10 = scmp.eq.s32.totalorder %s654_s24, 3 }
  0x10   : > { %1191 = sst [smem:[#allocation9_spill]] %s1215_s26  ;;  %p1015_p8 = por %p62_p6, %p61_p5 }
  0x11   : > { %p1019_p9 = por %p167_p7, %p55_p1  ;;  %s43_s6 = ssub.s32 %s912_s21, %s1215_s26 }
  0x12   : > { %s45_s7 = sor.u32 %s44_s28, %s43_s6  ;;  %p1025_p12 = por %p173_p10, %p61_p5 }
  0x13   : > { %s1193_s5 = scalar_select %p1019_p9, 1, 0 }
  0x14   : > { %p46_p11 = scmp.eq.s32.totalorder %s45_s7, 0  ;;  %p697_p13 = scmp.lt.s32.totalorder %s916_s22, 4 }
  0x15   : > { %s1194_s8 = scalar_select %p1025_p12, 1, 0 }
  0x16   : > { %s214_s9 = sand.u32 1, %s896_s17   ;;  %s661_s12 = sshll.u32 %s908_s20, 1 }
  0x17   : > { %s1032_s10 = scalar_select %p46_p11, %s896_s17, %s48_s27  }
  0x18   : > { %s660_s11 = sshll.u32 %s214_s9, 3  ;;  %s662_s13 = sshll.u32 %s912_s21, 2 }
  0x19   : > { %s218_s14 = scalar_lea.vmem [#allocation3], %s660_s11  ;;  %s224_s26 = sadd.s32 %s662_s13, %s661_s12 }
  0x1a   : > { %s228_s23 = sshll.u32 %s218_s14, 4  ;;  %s663_s24 = sshll.u32 %s224_s26, 6  ;;  %s1036_s23 = int_to_ptr.vmem [resolvable:$true] %s228_s23 }
  0x1b   : > { %p1040_p0 = pnand %p697_p13, %p1007_p3  ;;  %s1047_s27 = scalar_lea.hbm %s1183_s0, %s663_s24 }
  0x1c   : > { %s215_s11 = scalar_lea.sflag [#allocation4], %s214_s9  ;;  %s788_s26 = scalar_lea.hbm %s1047_s27, 128 }
  0x1d   : > { %p789_p4 = scmp.ne.s32.totalorder %s1047_s27, %s788_s26  ;;  %p790_p3 = pneg %p1040_p0 }
  0x1e   : > { %s793_s13 = scalar_lea.hbm %s1183_s0, 512  ;;  %p794_p7 = scmp.lt.u32.totalorder %s1047_s27, %s1183_s0 }
  0x1f   : > { %p791_p5 = pnand %p790_p3, %p789_p4  ;;  %p795_p10 = scmp.lt.u32.totalorder %s793_s13, %s788_s26 }
  0x20   : > { %p797_p13 = scmp.lt.u32.totalorder %s788_s26, %s1047_s27 }
  0x21   : > { %p792_p6 = pneg %p791_p5  ;;  %p796_p11 = por %p795_p10, %p794_p7 }
  0x23   : > { %p798_p1 = por %p797_p13, %p796_p11 }
  0x25   : > { %p799_p2 = pnand %p798_p1, %p792_p6 }
  0x27   : > { %802 = shalt.err (!%p799_p2)
}
  0x28   : > { %s803_s9 = scalar_lea.vmem %s1036_s23, 128  ;;  %s918_s6 = smov [#allocation3]  }
  0x29   : > { %p804_p4 = scmp.ne.s32.totalorder %s1036_s23, %s803_s9  ;;  %s808_s7 = sshll.u32 %s918_s6, 4  ;;  %s809_s7 = int_to_ptr.vmem [resolvable:$false] %s808_s7 }
  0x2a   : > { %s810_s29 = scalar_lea.vmem %s809_s7, 256  ;;  %p811_p9 = scmp.lt.s32.totalorder %s1036_s23, %s809_s7 }
  0x2b   : > { %p806_p5 = pnand %p804_p4, %p790_p3  ;;  %p812_p7 = scmp.lt.s32.totalorder %s810_s29, %s803_s9 }
  0x2d   : > { %p807_p12 = pneg %p806_p5  ;;  %p813_p10 = por %p812_p7, %p811_p9 }
  0x2f   : > { %p814_p11 = pnand %p813_p10, %p807_p12 }
  0x31   : > { %817 = shalt.err (!%p814_p11)
}
  0x32   : > { %692 = dma.hbm_to_vmem [thread:$0]  (!%p1040_p0), %s1047_s27, 128, %s1036_s23, %s215_s11  }
  0x33   : > { %p1196_p1 = scmp.lt.s32.totalorder %s916_s22, 5  ;;  %p1197_p2 = scmp.ge.s32.totalorder %s916_s22, 1 }
  0x35   : > { %p234_p3 = pnand %p1197_p2, %p1196_p1 }
  0x36   : > { %s1081_s26 = sand.u32 (!%p234_p3), 1, %s892_s16  }
  0x37   : > { %237 = sbr.rel (%p234_p3) target bundleno = 443 (0x1bb), region = 36  ;;  %s665_s12 = sshll.u32 (!%p234_p3), %s1081_s26, 3 }
  0x38   : > { %s240_s13 = scalar_lea.sflag (!%p234_p3), [#allocation4], %s1081_s26  ;;  %s243_s14 = scalar_lea.vmem (!%p234_p3), [#allocation3], %s665_s12 }
  0x3e   : > { %879 = dma.done.wait (%p1015_p8), %s240_s13, 128  }
  0x3f   : > { %881 = vsyncadd (%p1015_p8), %s240_s13, 4294967168  ;;  %vm294_vm0 = vcmask 1043456   ;;  %vm295_vm1 = vcmask 130052   ;;  %v298_v1 = vld [vmem:[%s243_s14] sm:$0xff]  ;;  %s919_s23 = smov 127   ;;  %s920_s28 = smov 110  }
  0x40   : > { %vm1090_vm2 = vmor %vm295_vm1, %vm294_vm0  ;;  %300 = vrot.lane.b32.xlu0 %v298_v1, %s919_s23  ;;  %318 = vrot.lane.b32.xlu1 %v298_v1, %s920_s28  ;;  %s921_s27 = smov 126   ;;  %s922_s11 = smov 109   ;;  %v927_v2 = vmov 0   ;;  %v476_v3 = vld [vmem:[%s1185_s2] sm:$0xff]  ;;  %vm303_vm3 = vcmask 1039360   ;;  %vm321_vm4 = vcmask 900096  }
  0x41   : > { %297 = vst.msk [vmem:[#allocation2] sm:$0xff] %vm1090_vm2, %v298_v1  ;;  %s923_s30 = smov 108   ;;  %s924_s24 = smov 92   ;;  %467 = vmatprep.mubr.bf16.mxu0 %v927_v2  ;;  %772 = vset.pattern.permute.xlu0 %v927_v2  ;;  %v484_v4 = vld [vmem:[%s1186_s3] sm:$0xff]  ;;  %vm312_vm5 = vcmask 1031168   ;;  %vm330_vm6 = vcmask 891904  }
  0x42   : > { %s925_s9 = smov 91   ;;  %s926_s6 = smov 90   ;;  %773 = vset.pattern.permute.xlu1 %v927_v2  ;;  %vm339_vm7 = vcmask 883712   ;;  %vm348_vm8 = vcmask 752640   ;;  %vm357_vm9 = vcmask 744448   ;;  %vm366_vm10 = vcmask 736256  }
  0x43   : > { %v370_v41 = vld [vmem:[%s1184_s1] sm:$0xf]  ;;  %vm425_vm11 = vcmask 588800   ;;  %s666_s28 = sshll.u32 %s1081_s26, 4  ;;  %vm495_vm12 = vcmask 130048   ;;  %s498_s29 = scalar_lea.sflag [#allocation5], %s1081_s26 }
  0x44   : > { %309 = vrot.lane.b32.xlu0 %v298_v1, %s921_s27  ;;  %327 = vrot.lane.b32.xlu1 %v298_v1, %s922_s11  ;;  %s680_s27 = sshll.u32 %s900_s18, 1  ;;  %s681_s11 = sshll.u32 %s904_s19, 2 }
  0x45   : > { %p1200_p9 = scmp.ne.s32.totalorder %s1193_s5, 0  ;;  %s928_s13 = smov [#allocation6]  }
  0x46   : > { %s822_s14 = sshll.u32 %s928_s13, 4  ;;  %s823_s14 = int_to_ptr.vmem [resolvable:$false] %s822_s14 }
  0x47   : > { %s824_s23 = scalar_lea.vmem %s823_s14, 512 }
  0x48   : > { %336 = vrot.lane.b32.xlu0 %v298_v1, %s923_s30  ;;  %345 = vrot.lane.b32.xlu1 %v298_v1, %s924_s24  ;;  %s512_s30 = sadd.s32 %s681_s11, %s680_s27 }
  0x49   : > { %s682_s24 = sshll.u32 %s512_s30, 7 }
  0x4a   : > { %s1129_s7 = scalar_lea.hbm %s1187_s4, %s682_s24 }
  0x4c   : > { %354 = vrot.lane.b32.xlu0 %v298_v1, %s925_s9  ;;  %363 = vrot.lane.b32.xlu1 %v298_v1, %s926_s6  ;;  %s279_s9 = scalar_lea.vmem [#allocation6], %s666_s28 }
  0x4d   : > { %s516_s6 = sshll.u32 %s279_s9, 4  ;;  %s1131_s6 = int_to_ptr.vmem [resolvable:$true] %s516_s6 }
  0x4e   : > { %s818_s12 = scalar_lea.vmem %s1131_s6, 256  ;;  %p825_p6 = scmp.lt.s32.totalorder %s1131_s6, %s823_s14 }
  0x4f   : > { %p819_p8 = scmp.ne.s32.totalorder %s1131_s6, %s818_s12  ;;  %p826_p13 = scmp.lt.s32.totalorder %s824_s23, %s818_s12 }
  0x50   : > { %479 = vperm.xlu0 %772, %v476_v3   ;;  %487 = vperm.xlu1 %773, %v484_v4  }
  0x51   : > { %p820_p12 = pnand %p819_p8, %p1200_p9  ;;  %p827_p4 = por %p826_p13, %p825_p6 }
  0x53   : > { %p821_p0 = pneg %p820_p12 }
  0x55   : > { %p828_p5 = pnand %p827_p4, %p821_p0 }
  0xb2   : > { %v301_v5 = vpop.permute.xlu0 %300  ;;  %v319_v6 = vpop.permute.xlu1 %318 }
  0xb3   : > { %v302_v7 = vrot.slane %v301_v5, 4  ;;  %v320_v8 = vrot.slane %v319_v6, 4 }
  0xb5   : > { %v304_v9 = vsel %vm303_vm3, %v301_v5, %v302_v7  ;;  %v322_v10 = vsel %vm321_vm4, %v319_v6, %v320_v8 }
  0xb6   : > { %306 = vst.msk [vmem:[#allocation2 + $0x8] sm:$0xff] %vm1090_vm2, %v304_v9  ;;  %324 = vst.msk [vmem:[#allocation2 + $0x18] sm:$0xff] %vm1090_vm2, %v322_v10  ;;  %v310_v11 = vpop.permute.xlu0 %309  ;;  %v328_v12 = vpop.permute.xlu1 %327 }
  0xb7   : > { %v311_v13 = vrot.slane %v310_v11, 4  ;;  %v329_v14 = vrot.slane %v328_v12, 4 }
  0xb9   : > { %v313_v15 = vsel %vm312_vm5, %v310_v11, %v311_v13  ;;  %v331_v16 = vsel %vm330_vm6, %v328_v12, %v329_v14 }
  0xba   : > { %315 = vst.msk [vmem:[#allocation2 + $0x10] sm:$0xff] %vm1090_vm2, %v313_v15  ;;  %333 = vst.msk [vmem:[#allocation2 + $0x20] sm:$0xff] %vm1090_vm2, %v331_v16  ;;  %v337_v17 = vpop.permute.xlu0 %336  ;;  %v346_v18 = vpop.permute.xlu1 %345 }
  0xbb   : > { %v338_v19 = vrot.slane %v337_v17, 4  ;;  %v347_v20 = vrot.slane %v346_v18, 4 }
  0xbd   : > { %v340_v21 = vsel %vm339_vm7, %v337_v17, %v338_v19  ;;  %v349_v22 = vsel %vm348_vm8, %v346_v18, %v347_v20  ;;  %v774_v23 = vld [vmem:[#allocation2 + $0x4] ss:$8 sps:$4 sm:$0xff]   ;;  %v776_v24 = vld [vmem:[#allocation2] ss:$8 sps:$4 sm:$0xff]  }
  0xbe   : > { %342 = vst.msk [vmem:[#allocation2 + $0x28] sm:$0xff] %vm1090_vm2, %v340_v21  ;;  %351 = vst.msk [vmem:[#allocation2 + $0x30] sm:$0xff] %vm1090_vm2, %v349_v22  ;;  %v355_v25 = vpop.permute.xlu0 %354  ;;  %v364_v26 = vpop.permute.xlu1 %363  ;;  %435 = vmatprep.subr.bf16.mxu0 %v774_v23 }
  0xbf   : > { %v356_v27 = vrot.slane %v355_v25, 4  ;;  %v365_v28 = vrot.slane %v364_v26, 4  ;;  %436 = vmatpush1.bf16.msra.mxu0 %v776_v24 }
  0xc1   : > { %v358_v29 = vsel %vm357_vm9, %v355_v25, %v356_v27  ;;  %v367_v30 = vsel %vm366_vm10, %v364_v26, %v365_v28  ;;  %v777_v31 = vld [vmem:[#allocation2 + $0x14] ss:$8 sps:$4 sm:$0xff]   ;;  %v779_v32 = vld [vmem:[#allocation2 + $0x10] ss:$8 sps:$4 sm:$0xff]  }
  0xc2   : > { %360 = vst.msk [vmem:[#allocation2 + $0x38] sm:$0xff] %vm1090_vm2, %v358_v29  ;;  %369 = vst.msk [vmem:[#allocation2 + $0x40] sm:$0xff] %vm1090_vm2, %v367_v30  ;;  %437 = vmatprep.subr.bf16.mxu0 %v777_v31 }
  0xc3   : > { %438 = vmatpush1.bf16.msra.mxu0 %v779_v32 }
  0xc5   : > { %v780_v33 = vld [vmem:[#allocation2 + $0x24] ss:$8 sps:$4 sm:$0xff]   ;;  %v782_v34 = vld [vmem:[#allocation2 + $0x20] ss:$8 sps:$4 sm:$0xff]  }
  0xc6   : > { %439 = vmatprep.subr.bf16.mxu0 %v780_v33 }
  0xc7   : > { %440 = vmatpush1.bf16.msra.mxu0 %v782_v34 }
  0xc9   : > { %v783_v35 = vld [vmem:[#allocation2 + $0x34] ss:$8 sps:$4 sm:$0xff]   ;;  %v785_v36 = vld [vmem:[#allocation2 + $0x30] ss:$8 sps:$4 sm:$0xff]   ;;  %v379_v37 = vld [vmem:[#allocation2 + $0x40] sm:$0xff] }
  0xca   : > { %441 = vmatprep.subr.bf16.mxu0 %v783_v35  ;;  %v676_v38 = vcombine.high %v379_v37, %v379_v37  ;;  %v675_v39 = vcombine.low %v379_v37, %v379_v37 }
  0xcb   : > { %442 = vmatpush1.bf16.msra.mxu0 %v785_v36 }
  0xcc   : > { %677 = vmatprep.subr.msk.bf16.mxu0 %vm294_vm0, %v676_v38  ;;  %v430_v40 = vsel %vm294_vm0, %v675_v39, 0 }
  0xcf   : > { %444 = vmatpush1.bf16.msra.mxu0 %v430_v40  ;;  %v480_v42 = vpop.permute.xlu0 %479  ;;  %v488_v44 = vpop.permute.xlu1 %487 }
  0xd2   : > { %678 = vmatmul.mubr.msk.bf16.vlgmr.msra.gmra.mrb[0].mxu0 %vm425_vm11, %v370_v41 }
 0x1a5   : > { %v469_v43 = vpop.f32.mrb[0].mxu0 }
 0x1a6   : > { %v482_v45 = vmul.f32 %v480_v42, %v469_v43  ;;  %v471_v46 = vpop.f32.mrb[1].mxu0 }
 0x1a7   : > { %v483_v47 = vmul.f32 %v480_v42, %v471_v46  ;;  %v473_v48 = vpop.f32.mrb[2].mxu0 }
 0x1a8   : > { %v490_v49 = vadd.f32 %v488_v44, %v482_v45  ;;  %v474_v50 = vpop.f32.mrb[3].mxu0 }
 0x1a9   : > { %v491_v51 = vadd.f32 %v488_v44, %v483_v47 }
 0x1aa   : > { %v492_v52 = vmax.f32 %v490_v49, 0.0 }
 0x1ab   : > { %v493_v53 = vmax.f32 %v491_v51, 0.0 }
 0x1ac   : > { %494 = vst [vmem:[%s279_s9] sm:$0xff] %v492_v52 }
 0x1ad   : > { %496 = vst.msk [vmem:[%s279_s9 + $0x8] sm:$0xff] %vm495_vm12, %v493_v53 }
 0x1ae   : > { %831 = shalt.err (!%p828_p5)
}
 0x1af   : > { %s832_s26 = scalar_lea.hbm %s1129_s7, 256  ;;  %s836_s11 = scalar_lea.hbm %s1187_s4, 1024 }
 0x1b0   : > { %p833_p7 = scmp.ne.s32.totalorder %s1129_s7, %s832_s26  ;;  %p837_p1 = scmp.lt.u32.totalorder %s1129_s7, %s1187_s4 }
 0x1b1   : > { %p838_p2 = scmp.lt.u32.totalorder %s836_s11, %s832_s26  ;;  %p840_p8 = scmp.lt.u32.totalorder %s832_s26, %s1129_s7 }
 0x1b2   : > { %p834_p10 = pnand %p833_p7, %p1200_p9 }
 0x1b3   : > { %p839_p3 = por %p838_p2, %p837_p1 }
 0x1b4   : > { %p835_p11 = pneg %p834_p10 }
 0x1b5   : > { %p841_p12 = por %p840_p8, %p839_p3 }
 0x1b7   : > { %p842_p0 = pnand %p841_p12, %p835_p11 }
 0x1b9   : > { %845 = shalt.err (!%p842_p0)
}
 0x1ba   : > { %687 = dma.vmem_to_hbm [thread:$0]  (%p1200_p9), %s1131_s6, 256, %s1129_s7, %s498_s29  }
 0x1bb PF: > { %p698_p6 = scmp.ge.s32.totalorder %s916_s22, 2  ;;  %s528_s9 = sand.u32 1, %s888_s15  }
 0x1bc   : > { %p1201_p13 = scmp.ne.s32.totalorder %s1194_s8, 0  ;;  %s529_s18 = scalar_lea.sflag [#allocation5], %s528_s9 }
 0x1be   : > { %p694_p4 = pnand %p698_p6, %p1201_p13 }
 0x1c0   : > { %883 = dma.done.wait (!%p694_p4), %s529_s18, 256  }
 0x1c1   : > { %885 = vsyncadd (!%p694_p4), %s529_s18, 4294967040  ;;  %s20_s22 = sadd.s32 1, %s916_s22   ;;  %s1202_s5 = sld [smem:[#allocation9_spill]] }
 0x1c2   : > { %p17_p5 = scmp.ge.s32.totalorder %s20_s22, 6   ;;  %s1203_s15 = smov %s892_s16 }
 0x1c3   : > { %s1204_s16 = smov %s896_s17  ;;  %s1205_s17 = smov %s1032_s10 }
 0x1c4   : > { %s1206_s18 = smov %s908_s20  ;;  %s1207_s19 = smov %s912_s21 }
 0x1c5   : > { %s1208_s20 = smov %s1211_s25  ;;  %19 = sbr.rel (!%p17_p5) target bundleno = 7 (0x7), region = 90 }
 0x1c7   : > { %s1209_s21 = smov %s1202_s5 }
 0x1cc   :  { %534 = vsyncpa [#allocation4], 1 }
 0x1cd   :  { %536 = vsyncpa [#allocation4 + $0x1], 1 }
 0x1ce   :  { %537 = vsyncpa [#allocation5], 1 }
 0x1cf   :  { %539 = vsyncpa [#allocation5 + $0x1], 1 }

</bundles_post_ra>
